<compile_context>
chip_gen: v7x
topology: tpu7x:2x2x1
jax: 0.10.0
libtpu: 0.0.40
codegen_flags: <defaults>
</compile_context>

<pallas_src>
import jax
import jax.numpy as jnp
from jax.experimental import pallas as pl
from jax.experimental.pallas import tpu as pltpu


def _round_up(n: int, m: int) -> int:
    return ((n + m - 1) // m) * m


def _chip_config():
    """Best-effort chip detection -> VMEM budget / tile cap / megacore split."""
    kind = ""
    try:
        kind = jax.devices()[0].device_kind.lower()
    except Exception:
        pass
    single_tc = any(t in kind for t in ("v2", "v3", "v5 lite", "v5e", "v6"))
    if single_tc:
        # v5e / v6e: one TensorCore, 128 MiB physical VMEM -> big row tiles,
        # generous scoped-VMEM limit, and no forced grid split.
        cfg = dict(vmem_budget=72 << 20, vmem_limit=96 << 20,
                   block_m_cap=1024, multi_tc=False)
    else:
        # v7x (64 MiB / TC), v4 / v5p megacore, or unknown: conservative
        # budget; split the grid so both TensorCores get work.
        cfg = dict(vmem_budget=24 << 20, vmem_limit=32 << 20,
                   block_m_cap=512, multi_tc=True)
    try:
        cap = pltpu.get_tpu_info().vmem_capacity_bytes
        cfg["vmem_budget"] = min(cfg["vmem_budget"], (cap * 3) // 4)
        cfg["vmem_limit"] = min(cfg["vmem_limit"], (cap * 7) // 8)
    except Exception:
        pass
    return cfg


def adapter_kernel(x_ref, w1t_ref, w2t_ref, o_ref):
    """One row tile of y = relu(relu(x @ W1^T) @ W2^T).

    x_ref  : (bm, C)  input row tile (storage dtype)
    w1t_ref: (C, H)   W1^T, pre-transposed / promoted / padded in the wrapper
    w2t_ref: (H, C)   W2^T, pre-transposed / promoted / padded in the wrapper
    o_ref  : (bm, C)  output row tile
    """
    w1t = w1t_ref[...]
    w2t = w2t_ref[...]
    # Weights already carry the promoted compute dtype, so this cast only ever
    # widens (never a silent f32 -> bf16 downcast of the activations).
    x = x_ref[...].astype(w1t.dtype)

    h = jnp.dot(x, w1t, preferred_element_type=jnp.float32)        # (bm, H)
    h = jnp.maximum(h, 0.0).astype(w2t.dtype)                      # ReLU

    y = jnp.dot(h, w2t, preferred_element_type=jnp.float32)        # (bm, C)
    o_ref[...] = jnp.maximum(y, 0.0).astype(o_ref.dtype)           # ReLU


def adapter_forward(x, w1, w2, *, block_m=None, compute_dtype=None):
    """Pallas wrapper.

    x : (..., C_in)   any leading dims, like nn.Linear
    w1: (H, C_in)     nn.Linear(c_in, c_in // reduction, bias=False).weight
    w2: (C_in, H)     nn.Linear(c_in // reduction, c_in, bias=False).weight
    Returns same shape/dtype as x.
    """
    orig_shape = x.shape
    C_in = orig_shape[-1]
    H = w1.shape[0]
    assert w1.shape == (H, C_in), w1.shape
    assert w2.shape == (C_in, H), w2.shape

    # Promoted compute dtype (matches PyTorch / jnp promotion).  bf16 compute
    # with f32 activations is an explicit opt-in via compute_dtype.
    if compute_dtype is None:
        compute_dtype = jnp.promote_types(
            jnp.promote_types(x.dtype, w1.dtype), w2.dtype)
    compute_dtype = jnp.dtype(compute_dtype)

    x2d = x.reshape(-1, C_in)
    M = x2d.shape[0]

    LANE = 128
    need_c_pad = (C_in % LANE) != 0
    C_pad = _round_up(C_in, LANE)
    H_pad = _round_up(H, LANE)

    cfg = _chip_config()
    row_align = 16 if x.dtype == jnp.bfloat16 else 8
    if block_m is None:
        if cfg["multi_tc"] and M > row_align:
            # >=2 grid steps so both TensorCores (v7x megacore) get work.
            block_m = min(cfg["block_m_cap"], _round_up(pl.cdiv(M, 2), row_align))
        else:
            # Single TensorCore: a forced split only adds pipeline overhead.
            block_m = min(cfg["block_m_cap"], _round_up(M, row_align))
    block_m = max(row_align, _round_up(block_m, row_align))

    x_itemsize = jnp.dtype(x.dtype).itemsize
    w_itemsize = compute_dtype.itemsize

    # Weights have constant index maps -> single-buffered in VMEM.
    w_buf_bytes = (C_pad * H_pad + H_pad * C_pad) * w_itemsize
    if w_buf_bytes > cfg["vmem_budget"]:
        # TODO(synk): add a K/N-tiled weight path (extra "arbitrary" grid axis
        # over C or H with an f32 accumulator scratch) for very large c_in
        # instead of failing; resident weights alone do not fit VMEM here.
        raise NotImplementedError(
            f"Adapter weights ({w_buf_bytes / 2**20:.1f} MiB) exceed the VMEM "
            f"budget ({cfg['vmem_budget'] / 2**20:.1f} MiB); need weight tiling.")

    def _footprint(bm):
        return (2 * bm * C_pad * x_itemsize        # x tiles   (double-buffered)
                + 2 * bm * C_pad * x_itemsize      # out tiles (double-buffered)
                + bm * C_pad * 4                   # x promoted to compute/f32
                + bm * H_pad * 4                   # hidden f32 intermediate
                + bm * C_pad * 4                   # output f32 before downcast
                + w_buf_bytes)

    while block_m > row_align and _footprint(block_m) > cfg["vmem_budget"]:
        block_m = max(row_align, _round_up(block_m // 2, row_align))

    grid = (pl.cdiv(M, block_m),)

    # One-time static weight prep (transpose + promote + zero-pad).  Zero
    # padding is exact ONLY because both Linears are bias-free and ReLU(0)=0.
    w1t = w1.T.astype(compute_dtype)               # (C_in, H)
    w2t = w2.T.astype(compute_dtype)               # (H, C_in)
    if C_pad != C_in or H_pad != H:
        w1t = jnp.pad(w1t, ((0, C_pad - C_in), (0, H_pad - H)))
        w2t = jnp.pad(w2t, ((0, H_pad - H), (0, C_pad - C_in)))

    # Rows (M) are never padded: Pallas masks the partial final row tile.  The
    # lane dim is padded only when C_in is not a multiple of 128, so in the
    # common case x / y are touched exactly once in HBM with no extra copies.
    if need_c_pad:
        x2d = jnp.pad(x2d, ((0, 0), (0, C_pad - C_in)))

    cost = pl.CostEstimate(
        flops=4 * M * C_in * H,                               # two matmuls
        transcendentals=0,
        bytes_accessed=(2 * M * C_in * x_itemsize             # read x, write y
                        + 2 * C_in * H * w_itemsize),         # read W1, W2
    )

    def _call(single_buffer_weights):
        w_kwargs = ({"pipeline_mode": pl.Buffered(1)}
                    if single_buffer_weights else {})
        return pl.pallas_call(
            adapter_kernel,
            out_shape=jax.ShapeDtypeStruct((M, C_pad), x.dtype),
            grid=grid,
            in_specs=[
                # NOTE: if xprof shows exposed x DMA on v6e at large M, bump
                # this spec to pipeline_mode=pl.Buffered(3).
                pl.BlockSpec((block_m, C_pad), lambda i: (i, 0)),   # x row tile
                pl.BlockSpec((C_pad, H_pad), lambda i: (0, 0), **w_kwargs),  # W1^T
                pl.BlockSpec((H_pad, C_pad), lambda i: (0, 0), **w_kwargs),  # W2^T
            ],
            out_specs=pl.BlockSpec((block_m, C_pad), lambda i: (i, 0)),
            compiler_params=pltpu.CompilerParams(
                dimension_semantics=("parallel",),
                vmem_limit_bytes=cfg["vmem_limit"],
            ),
            cost_estimate=cost,
        )(x2d, w1t, w2t)

    try:
        out = _call(True)        # single-buffered resident weights (saves VMEM)
    except Exception:
        out = _call(False)       # fall back to default (double) buffering

    if need_c_pad:
        out = out[:, :C_in]
    return out.reshape(orig_shape)


def adapter_reference(x, w1, w2):
    """Pure-JAX reference matching the PyTorch module exactly."""
    h = jnp.maximum(x @ w1.T, 0.0)
    y = jnp.maximum(h @ w2.T, 0.0)
    return y.astype(x.dtype)


if __name__ == "__main__":
    key = jax.random.PRNGKey(0)
    kx1, kw1, kw2, kx2, kx3, kw3, kw4 = jax.random.split(key, 7)

    # Case 1: lane-aligned c_in (common fast path: no pads, no slices).
    B, S, C_in, reduction = 2, 4, 128, 4
    H = C_in // reduction
    b1 = (1.0 / C_in) ** 0.5
    b2 = (1.0 / H) ** 0.5
    x = jax.random.normal(kx1, (B, S, C_in), dtype=jnp.float32)
    w1 = jax.random.uniform(kw1, (H, C_in), jnp.float32, minval=-b1, maxval=b1)
    w2 = jax.random.uniform(kw2, (C_in, H), jnp.float32, minval=-b2, maxval=b2)
    out = jax.block_until_ready(adapter_forward(x, w1, w2))
    ref = adapter_reference(x, w1, w2)
    assert out.shape == x.shape and out.dtype == x.dtype
    assert jnp.allclose(out, ref, atol=1e-4, rtol=1e-4), "mismatch (aligned)"

    # Case 2: M = 15 rows with block_m = 8 -> exercises the masked partial
    # final row tile (no wrapper-side row padding or output slicing).
    x2 = jax.random.normal(kx2, (3, 5, C_in), dtype=jnp.float32)
    out2 = jax.block_until_ready(adapter_forward(x2, w1, w2, block_m=8))
    ref2 = adapter_reference(x2, w1, w2)
    assert out2.shape == x2.shape and out2.dtype == x2.dtype
    assert jnp.allclose(out2, ref2, atol=1e-4, rtol=1e-4), "mismatch (partial tile)"

    # Case 3: c_in not a multiple of 128 -> lane-pad path.
    C3, r3 = 32, 4
    H3 = C3 // r3
    b3 = (1.0 / C3) ** 0.5
    b4 = (1.0 / H3) ** 0.5
    x3 = jax.random.normal(kx3, (2, 4, C3), dtype=jnp.float32)
    w3 = jax.random.uniform(kw3, (H3, C3), jnp.float32, minval=-b3, maxval=b3)
    w4 = jax.random.uniform(kw4, (C3, H3), jnp.float32, minval=-b4, maxval=b4)
    out3 = jax.block_until_ready(adapter_forward(x3, w3, w4))
    ref3 = adapter_reference(x3, w3, w4)
    assert out3.shape == x3.shape and out3.dtype == x3.dtype
    assert jnp.allclose(out3, ref3, atol=1e-4, rtol=1e-4), "mismatch (lane pad)"

    print("KERNEL_OK")
</pallas_src>

<mosaic_0001>
module attributes {stable_mosaic.version = 11 : i64} {
  func.func @adapter_kernel(%arg0: i32, %arg1: memref<8x128xf32, #tpu.memory_space<vmem>>, %arg2: memref<128x128xf32, #tpu.memory_space<vmem>>, %arg3: memref<128x128xf32, #tpu.memory_space<vmem>>, %arg4: memref<8x128xf32, #tpu.memory_space<vmem>>) attributes {dimension_semantics = [#tpu.dimension_semantics<parallel>], iteration_bounds = array<i64: 1>, scalar_prefetch = 0 : i64, scratch_operands = 0 : i64, tpu.core_type = #tpu.core_type<tc>, window_params = [{transform_indices = @transform_0, window_bounds = array<i64: 8, 128>}, {pipeline_mode = #tpu.pipeline_mode<synchronous>, transform_indices = @transform_1, window_bounds = array<i64: 128, 128>}, {pipeline_mode = #tpu.pipeline_mode<synchronous>, transform_indices = @transform_2, window_bounds = array<i64: 128, 128>}, {transform_indices = @transform_3, window_bounds = array<i64: 8, 128>}]} {
    %c0 = arith.constant 0 : index
    %c0_0 = arith.constant 0 : index
    %0 = vector.load %arg2[%c0, %c0_0] : memref<128x128xf32, #tpu.memory_space<vmem>>, vector<128x128xf32>
    %c0_1 = arith.constant 0 : index
    %c0_2 = arith.constant 0 : index
    %1 = vector.load %arg3[%c0_1, %c0_2] : memref<128x128xf32, #tpu.memory_space<vmem>>, vector<128x128xf32>
    %c0_3 = arith.constant 0 : index
    %c0_4 = arith.constant 0 : index
    %2 = vector.load %arg1[%c0_3, %c0_4] : memref<8x128xf32, #tpu.memory_space<vmem>>, vector<8x128xf32>
    %cst = arith.constant dense<0.000000e+00> : vector<8x128xf32>
    %3 = tpu.matmul %2, %0, %cst {dimension_numbers = #tpu.dot_dimension_numbers<[1], [0], [0], [1], [0, 0, 1, 1], [], []>} : vector<8x128xf32>, vector<128x128xf32>, vector<8x128xf32> -> vector<8x128xf32>
    %cst_5 = arith.constant 0.000000e+00 : f32
    %4 = vector.broadcast %cst_5 : f32 to vector<8x128xf32>
    %5 = arith.maximumf %3, %4 : vector<8x128xf32>
    %cst_6 = arith.constant dense<0.000000e+00> : vector<8x128xf32>
    %6 = tpu.matmul %5, %1, %cst_6 {dimension_numbers = #tpu.dot_dimension_numbers<[1], [0], [0], [1], [0, 0, 1, 1], [], []>} : vector<8x128xf32>, vector<128x128xf32>, vector<8x128xf32> -> vector<8x128xf32>
    %cst_7 = arith.constant 0.000000e+00 : f32
    %7 = vector.broadcast %cst_7 : f32 to vector<8x128xf32>
    %8 = arith.maximumf %6, %7 : vector<8x128xf32>
    %c0_8 = arith.constant 0 : index
    %c0_9 = arith.constant 0 : index
    %9 = vector.load %arg4[%c0_8, %c0_9] : memref<8x128xf32, #tpu.memory_space<vmem>>, vector<8x128xf32>
    tpu.vector_store %arg4[%c0_8, %c0_9], %8 {strides = array<i32>} : memref<8x128xf32, #tpu.memory_space<vmem>>, vector<8x128xf32>,
    return
  }
  func.func @transform_0(%arg0: i32) -> (i32, i32) {
    %c0_i32 = arith.constant 0 : i32
    %c0_i32_0 = arith.constant 0 : i32
    return %arg0, %c0_i32 : i32, i32
  }
  func.func @transform_1(%arg0: i32) -> (i32, i32) {
    %c0_i32 = arith.constant 0 : i32
    %c0_i32_0 = arith.constant 0 : i32
    %c0_i32_1 = arith.constant 0 : i32
    return %c0_i32, %c0_i32_0 : i32, i32
  }
  func.func @transform_2(%arg0: i32) -> (i32, i32) {
    %c0_i32 = arith.constant 0 : i32
    %c0_i32_0 = arith.constant 0 : i32
    %c0_i32_1 = arith.constant 0 : i32
    return %c0_i32, %c0_i32_0 : i32, i32
  }
  func.func @transform_3(%arg0: i32) -> (i32, i32) {
    %c0_i32 = arith.constant 0 : i32
    %c0_i32_0 = arith.constant 0 : i32
    return %arg0, %c0_i32 : i32, i32
  }
}

module attributes {stable_mosaic.version = 11 : i64} {
  func.func @adapter_kernel(%arg0: i32, %arg1: memref<8x128xf32, #tpu.memory_space<vmem>>, %arg2: memref<128x128xf32, #tpu.memory_space<vmem>>, %arg3: memref<128x128xf32, #tpu.memory_space<vmem>>, %arg4: memref<8x128xf32, #tpu.memory_space<vmem>>) attributes {dimension_semantics = [#tpu.dimension_semantics<parallel>], iteration_bounds = array<i64: 1>, scalar_prefetch = 0 : i64, scratch_operands = 0 : i64, tpu.core_type = #tpu.core_type<tc>, window_params = [{transform_indices = @transform_0, window_bounds = array<i64: 8, 128>}, {pipeline_mode = #tpu.pipeline_mode<synchronous>, transform_indices = @transform_1, window_bounds = array<i64: 128, 128>}, {pipeline_mode = #tpu.pipeline_mode<synchronous>, transform_indices = @transform_2, window_bounds = array<i64: 128, 128>}, {transform_indices = @transform_3, window_bounds = array<i64: 8, 128>}]} {
    %c0 = arith.constant 0 : index
    %c0_0 = arith.constant 0 : index
    %0 = vector.load %arg2[%c0, %c0_0] : memref<128x128xf32, #tpu.memory_space<vmem>>, vector<128x128xf32>
    %c0_1 = arith.constant 0 : index
    %c0_2 = arith.constant 0 : index
    %1 = vector.load %arg3[%c0_1, %c0_2] : memref<128x128xf32, #tpu.memory_space<vmem>>, vector<128x128xf32>
    %c0_3 = arith.constant 0 : index
    %c0_4 = arith.constant 0 : index
    %2 = vector.load %arg1[%c0_3, %c0_4] : memref<8x128xf32, #tpu.memory_space<vmem>>, vector<8x128xf32>
    %cst = arith.constant dense<0.000000e+00> : vector<8x128xf32>
    %3 = tpu.matmul %2, %0, %cst {dimension_numbers = #tpu.dot_dimension_numbers<[1], [0], [0], [1], [0, 0, 1, 1], [], []>} : vector<8x128xf32>, vector<128x128xf32>, vector<8x128xf32> -> vector<8x128xf32>
    %cst_5 = arith.constant 0.000000e+00 : f32
    %4 = vector.broadcast %cst_5 : f32 to vector<8x128xf32>
    %5 = arith.maximumf %3, %4 : vector<8x128xf32>
    %cst_6 = arith.constant dense<0.000000e+00> : vector<8x128xf32>
    %6 = tpu.matmul %5, %1, %cst_6 {dimension_numbers = #tpu.dot_dimension_numbers<[1], [0], [0], [1], [0, 0, 1, 1], [], []>} : vector<8x128xf32>, vector<128x128xf32>, vector<8x128xf32> -> vector<8x128xf32>
    %cst_7 = arith.constant 0.000000e+00 : f32
    %7 = vector.broadcast %cst_7 : f32 to vector<8x128xf32>
    %8 = arith.maximumf %6, %7 : vector<8x128xf32>
    %c0_8 = arith.constant 0 : index
    %c0_9 = arith.constant 0 : index
    %9 = vector.load %arg4[%c0_8, %c0_9] : memref<8x128xf32, #tpu.memory_space<vmem>>, vector<8x128xf32>
    tpu.vector_store %arg4[%c0_8, %c0_9], %8 {strides = array<i32>} : memref<8x128xf32, #tpu.memory_space<vmem>>, vector<8x128xf32>,
    return
  }
  func.func @transform_0(%arg0: i32) -> (i32, i32) {
    %c0_i32 = arith.constant 0 : i32
    %c0_i32_0 = arith.constant 0 : i32
    return %arg0, %c0_i32 : i32, i32
  }
  func.func @transform_1(%arg0: i32) -> (i32, i32) {
    %c0_i32 = arith.constant 0 : i32
    %c0_i32_0 = arith.constant 0 : i32
    %c0_i32_1 = arith.constant 0 : i32
    return %c0_i32, %c0_i32_0 : i32, i32
  }
  func.func @transform_2(%arg0: i32) -> (i32, i32) {
    %c0_i32 = arith.constant 0 : i32
    %c0_i32_0 = arith.constant 0 : i32
    %c0_i32_1 = arith.constant 0 : i32
    return %c0_i32, %c0_i32_0 : i32, i32
  }
  func.func @transform_3(%arg0: i32) -> (i32, i32) {
    %c0_i32 = arith.constant 0 : i32
    %c0_i32_0 = arith.constant 0 : i32
    return %arg0, %c0_i32 : i32, i32
  }
}

</mosaic_0001>

<bundles_post_ra>
// kernel: tpu_custom_call.1
= control target key start
LH: loop header
LB: loop body
LE: loop exit
PB: predicated region body
PF: predicated region fallthrough
CT: control target
= control target key end

     0   :  { %8 = vsyncpa [#allocation3], 0  ;;  %s600_s0 = inlined_call_operand.hbm [shape: f32[8,128], index: 0, kind: input, shape index: {}]   ;;  %s601_s1 = inlined_call_operand.hbm [shape: f32[128,128], index: 1, kind: input, shape index: {}]   ;;  %s602_s2 = inlined_call_operand.hbm [shape: f32[128,128], index: 2, kind: input, shape index: {}]   ;;  %s603_s3 = inlined_call_operand.hbm [shape: f32[8,128], index: 3, kind: output, shape index: {}]  }
   0x1   :  { %9 = vsyncpa [#allocation6], 0 }
   0x2   :  { %10 = vsyncpa [#allocation4], 0  ;;  %s501_s12 = smov [#allocation5]   ;;  %s407_s16 = scalar_lea.hbm %s601_s1, 2048 }
   0x3   :  { %s26_s13 = sshll.u32 %s501_s12, 4  ;;  %p408_p0 = scmp.ne.s32.totalorder %s601_s1, %s407_s16  ;;  %s27_s13 = int_to_ptr.vmem [resolvable:$true] %s26_s13 }
   0x4   :  { %p411_p1 = scmp.lt.u32.totalorder %s407_s16, %s601_s1 }
   0x6   :  { %p413_p2 = pnand %p411_p1, %p408_p0 }
   0x8   :  { %416 = shalt.err (!%p413_p2)
}
   0x9   :  { %s417_s21 = scalar_lea.vmem %s27_s13, 2048  ;;  %p422_p4 = scmp.lt.s32.totalorder %s27_s13, %s27_s13 }
   0xa   :  { %p418_p3 = scmp.ne.s32.totalorder %s27_s13, %s417_s21  ;;  %p423_p5 = scmp.lt.s32.totalorder %s417_s21, %s417_s21 }
   0xc   :  { %p424_p6 = por %p423_p5, %p422_p4 }
   0xe   :  { %p425_p7 = pnand %p424_p6, %p418_p3 }
  0x10   :  { %428 = shalt.err (!%p425_p7)
}
  0x11   :  { %s502_s22 = smov 128   ;;  %s503_s23 = smov 8  }
  0x12   :  { %32 = dma.hbm_to_vmem [thread:$0]  %s601_s1, 2048, %s27_s13, [#allocation6], %s502_s22, %s502_s22, %s503_s23  }
  0x13   :  { %s504_s26 = smov [#allocation2]   ;;  %s505_s28 = smov [#allocation7]  }
  0x14   :  { %s17_s27 = sshll.u32 %s504_s26, 4  ;;  %s38_s29 = sshll.u32 %s505_s28, 4  ;;  %s18_s27 = int_to_ptr.vmem [resolvable:$true] %s17_s27  ;;  %s39_s29 = int_to_ptr.vmem [resolvable:$true] %s38_s29 }
  0x15   :  { %s429_s5 = scalar_lea.hbm %s600_s0, 128 }
  0x16   :  { %p430_p8 = scmp.ne.s32.totalorder %s600_s0, %s429_s5  ;;  %p433_p9 = scmp.lt.u32.totalorder %s429_s5, %s600_s0 }
  0x18   :  { %p435_p10 = pnand %p433_p9, %p430_p8 }
  0x1a   :  { %438 = shalt.err (!%p435_p10)
}
  0x1b   :  { %s439_s1 = scalar_lea.vmem %s18_s27, 128  ;;  %p444_p12 = scmp.lt.s32.totalorder %s18_s27, %s18_s27 }
  0x1c   :  { %p440_p11 = scmp.ne.s32.totalorder %s18_s27, %s439_s1  ;;  %p445_p13 = scmp.lt.s32.totalorder %s439_s1, %s439_s1 }
  0x1e   :  { %p446_p0 = por %p445_p13, %p444_p12 }
  0x20   :  { %p447_p1 = pnand %p446_p0, %p440_p11 }
  0x22   :  { %450 = shalt.err (!%p447_p1)
}
  0x23   :  { %20 = dma.hbm_to_vmem [thread:$0]  %s600_s0, 128, %s18_s27, [#allocation3]  }
  0x24   :  { %s451_s14 = scalar_lea.hbm %s602_s2, 2048 }
  0x25   :  { %p452_p2 = scmp.ne.s32.totalorder %s602_s2, %s451_s14  ;;  %p455_p3 = scmp.lt.u32.totalorder %s451_s14, %s602_s2 }
  0x27   :  { %p457_p4 = pnand %p455_p3, %p452_p2 }
  0x29   :  { %460 = shalt.err (!%p457_p4)
}
  0x2a   :  { %s461_s19 = scalar_lea.vmem %s39_s29, 2048  ;;  %p466_p6 = scmp.lt.s32.totalorder %s39_s29, %s39_s29 }
  0x2b   :  { %p462_p5 = scmp.ne.s32.totalorder %s39_s29, %s461_s19  ;;  %p467_p7 = scmp.lt.s32.totalorder %s461_s19, %s461_s19 }
  0x2d   :  { %p468_p8 = por %p467_p7, %p466_p6 }
  0x2f   :  { %p469_p9 = pnand %p468_p8, %p462_p5 }
  0x31   :  { %472 = shalt.err (!%p469_p9)
}
  0x32   :  { %44 = dma.hbm_to_vmem [thread:$0]  %s602_s2, 2048, %s39_s29, [#allocation6], %s502_s22, %s502_s22, %s503_s23  }
  0x33   :  { %495 = dma.done.wait [#allocation3], 128  }
  0x34   :  { %496 = vsyncadd [#allocation3], 4294967168 }
  0x35   :  { %497 = dma.done.wait [#allocation6], 4096  }
  0x36   :  { %498 = vsyncadd [#allocation6], 4294963200  ;;  %v506_v0 = vmov 0.0|0.0   ;;  %vm507_vm0 = vmmov 0   ;;  %v508_v1 = vmov 0.0   ;;  %v54_v2 = vld [vmem:[#allocation5] sm:$0xff] }
  0x37   :  { %350 = vmatprep.subr.bf16.mxu0 %v506_v0  ;;  %312 = vmatprep.mubr.msk.f32.mxu0 %vm507_vm0, %v508_v1  ;;  %v55_v3 = vld [vmem:[#allocation5 + $0x8] sm:$0xff]  ;;  %v56_v4 = vld [vmem:[#allocation5 + $0x10] sm:$0xff]  ;;  %v57_v6 = vld [vmem:[#allocation5 + $0x18] sm:$0xff]  ;;  %s509_s2 = smov [#allocation8]  }
  0x38   :  { %374 = vmatprep.subr.bf16.mxu1 %v506_v0  ;;  %347 = vmatprep.mubr.msk.f32.mxu1 %vm507_vm0, %v508_v1  ;;  %v351_v5 = vpack.c.bf16 %v55_v3, %v54_v2  ;;  %v354_v7 = vpack.c.bf16 %v57_v6, %v56_v4  ;;  %v58_v8 = vld [vmem:[#allocation5 + $0x20] sm:$0xff]  ;;  %v59_v9 = vld [vmem:[#allocation5 + $0x28] sm:$0xff]  ;;  %v72_v12 = vld [vmem:[#allocation7 + $0x10] sm:$0xff]  ;;  %s236_s21 = sshll.u32 %s509_s2, 4  ;;  %s237_s21 = int_to_ptr.vmem [resolvable:$true] %s236_s21 }
  0x39   :  { %v70_v10 = vld [vmem:[#allocation7] sm:$0xff]  ;;  %v71_v11 = vld [vmem:[#allocation7 + $0x8] sm:$0xff]  ;;  %v73_v13 = vld [vmem:[#allocation7 + $0x18] sm:$0xff]  ;;  %v357_v14 = vpack.c.bf16 %v59_v9, %v58_v8  ;;  %s473_s22 = scalar_lea.vmem %s237_s21, 128  ;;  %p478_p11 = scmp.lt.s32.totalorder %s237_s21, %s237_s21 }
  0x3a   :  { %352 = vmatpush3.bf16.msra.mxu0 %v351_v5  ;;  %v375_v15 = vpack.c.bf16 %v71_v11, %v70_v10  ;;  %v60_v16 = vld [vmem:[#allocation5 + $0x30] sm:$0xff]  ;;  %v61_v17 = vld [vmem:[#allocation5 + $0x38] sm:$0xff]  ;;  %v378_v18 = vpack.c.bf16 %v73_v13, %v72_v12  ;;  %v74_v19 = vld [vmem:[#allocation7 + $0x20] sm:$0xff]  ;;  %p474_p10 = scmp.ne.s32.totalorder %s237_s21, %s473_s22  ;;  %p479_p12 = scmp.lt.s32.totalorder %s473_s22, %s473_s22 }
  0x3b   :  { %353 = vmatprep.subr.bf16.mxu0 %v506_v0  ;;  %v75_v20 = vld [vmem:[#allocation7 + $0x28] sm:$0xff]  ;;  %v360_v21 = vpack.c.bf16 %v61_v17, %v60_v16  ;;  %v62_v22 = vld [vmem:[#allocation5 + $0x40] sm:$0xff]  ;;  %v76_v25 = vld [vmem:[#allocation7 + $0x30] sm:$0xff] }
  0x3c   :  { %376 = vmatpush3.bf16.msra.mxu1 %v375_v15  ;;  %v63_v23 = vld [vmem:[#allocation5 + $0x48] sm:$0xff]  ;;  %v381_v24 = vpack.c.bf16 %v75_v20, %v74_v19  ;;  %v77_v26 = vld [vmem:[#allocation7 + $0x38] sm:$0xff]  ;;  %v64_v28 = vld [vmem:[#allocation5 + $0x50] sm:$0xff]  ;;  %p480_p13 = por %p479_p12, %p478_p11 }
  0x3d   :  { %377 = vmatprep.subr.bf16.mxu1 %v506_v0  ;;  %v363_v27 = vpack.c.bf16 %v63_v23, %v62_v22  ;;  %v65_v29 = vld [vmem:[#allocation5 + $0x58] sm:$0xff]  ;;  %v384_v30 = vpack.c.bf16 %v77_v26, %v76_v25  ;;  %v78_v31 = vld [vmem:[#allocation7 + $0x40] sm:$0xff]  ;;  %v79_v32 = vld [vmem:[#allocation7 + $0x48] sm:$0xff] }
  0x3e   :  { %355 = vmatpush3.bf16.msra.mxu0 %v354_v7  ;;  %v366_v33 = vpack.c.bf16 %v65_v29, %v64_v28  ;;  %v66_v34 = vld [vmem:[#allocation5 + $0x60] sm:$0xff]  ;;  %v67_v35 = vld [vmem:[#allocation5 + $0x68] sm:$0xff]  ;;  %v387_v36 = vpack.c.bf16 %v79_v32, %v78_v31  ;;  %v80_v37 = vld [vmem:[#allocation7 + $0x50] sm:$0xff]  ;;  %p481_p0 = pnand %p480_p13, %p474_p10 }
  0x3f   :  { %356 = vmatprep.subr.bf16.mxu0 %v506_v0  ;;  %v81_v38 = vld [vmem:[#allocation7 + $0x58] sm:$0xff]  ;;  %v369_v39 = vpack.c.bf16 %v67_v35, %v66_v34  ;;  %v68_v40 = vld [vmem:[#allocation5 + $0x70] sm:$0xff]  ;;  %v82_v43 = vld [vmem:[#allocation7 + $0x60] sm:$0xff] }
  0x40   :  { %379 = vmatpush3.bf16.msra.mxu1 %v378_v18  ;;  %v69_v41 = vld [vmem:[#allocation5 + $0x78] sm:$0xff]  ;;  %v390_v42 = vpack.c.bf16 %v81_v38, %v80_v37  ;;  %v83_v44 = vld [vmem:[#allocation7 + $0x68] sm:$0xff]  ;;  %v84_v48 = vld [vmem:[#allocation7 + $0x70] sm:$0xff] }
  0x41   :  { %380 = vmatprep.subr.bf16.mxu1 %v506_v0  ;;  %v372_v45 = vpack.c.bf16 %v69_v41, %v68_v40  ;;  %v393_v46 = vpack.c.bf16 %v83_v44, %v82_v43  ;;  %v86_v47 = vld [vmem:[#allocation2] sm:$0xff] }
  0x42   :  { %358 = vmatpush3.bf16.msra.mxu0 %v357_v14  ;;  %v85_v49 = vld [vmem:[#allocation7 + $0x78] sm:$0xff] }
  0x43   :  { %359 = vmatprep.subr.bf16.mxu0 %v506_v0  ;;  %v396_v50 = vpack.c.bf16 %v85_v49, %v84_v48 }
  0x44   :  { %382 = vmatpush3.bf16.msra.mxu1 %v381_v24 }
  0x45   :  { %383 = vmatprep.subr.bf16.mxu1 %v506_v0 }
  0x46   :  { %361 = vmatpush3.bf16.msra.mxu0 %v360_v21 }
  0x47   :  { %362 = vmatprep.subr.bf16.mxu0 %v506_v0 }
  0x48   :  { %385 = vmatpush3.bf16.msra.mxu1 %v384_v30 }
  0x49   :  { %386 = vmatprep.subr.bf16.mxu1 %v506_v0 }
  0x4a   :  { %364 = vmatpush3.bf16.msra.mxu0 %v363_v27 }
  0x4b   :  { %365 = vmatprep.subr.bf16.mxu0 %v506_v0 }
  0x4c   :  { %388 = vmatpush3.bf16.msra.mxu1 %v387_v36 }
  0x4d   :  { %389 = vmatprep.subr.bf16.mxu1 %v506_v0 }
  0x4e   :  { %367 = vmatpush3.bf16.msra.mxu0 %v366_v33 }
  0x4f   :  { %368 = vmatprep.subr.bf16.mxu0 %v506_v0 }
  0x50   :  { %391 = vmatpush3.bf16.msra.mxu1 %v390_v42 }
  0x51   :  { %392 = vmatprep.subr.bf16.mxu1 %v506_v0 }
  0x52   :  { %370 = vmatpush3.bf16.msra.mxu0 %v369_v39 }
  0x53   :  { %371 = vmatprep.subr.bf16.mxu0 %v506_v0 }
  0x54   :  { %394 = vmatpush3.bf16.msra.mxu1 %v393_v46 }
  0x55   :  { %395 = vmatprep.subr.bf16.mxu1 %v506_v0 }
  0x56   :  { %373 = vmatpush3.bf16.msra.mxu0 %v372_v45 }
  0x58   :  { %397 = vmatpush3.bf16.msra.mxu1 %v396_v50 }
  0x59   :  { %313 = vmatmul.mubr.f32.vlgmr.msra.gmra.mrb[0].mxu0 %v86_v47 }
 0x12c   :  { %v153_v51 = vpop.f32.mrb[0].mxu0 }
 0x12d   :  { %v157_v52 = vmax.f32 %v153_v51, 0.0  ;;  %v314_v53 = vpop.f32.mrb[1].mxu0 }
 0x12f   :  { %348 = vmatmul.mubr.f32.vlgmr.msra.gmra.mrb[0].mxu1 %v157_v52 }
 0x202   :  { %v224_v54 = vpop.f32.mrb[0].mxu1 }
 0x203   :  { %v228_v55 = vmax.f32 %v224_v54, 0.0  ;;  %v349_v56 = vpop.f32.mrb[1].mxu1 }
 0x205   :  { %229 = vst [vmem:[#allocation8] sm:$0xff] %v228_v55 }
 0x206   :  { %484 = shalt.err (!%p481_p0)
}
 0x207   :  { %s485_s25 = scalar_lea.hbm %s603_s3, 128 }
 0x208   :  { %p486_p1 = scmp.ne.s32.totalorder %s603_s3, %s485_s25  ;;  %p489_p2 = scmp.lt.u32.totalorder %s485_s25, %s603_s3 }
 0x20a   :  { %p491_p3 = pnand %p489_p2, %p486_p1 }
 0x20c   :  { %494 = shalt.err (!%p491_p3)
}
 0x20d   :  { %239 = dma.vmem_to_hbm [thread:$0]  %s237_s21, 128, %s603_s3, [#allocation4]  }
 0x20e   :  { %499 = dma.done.wait [#allocation4], 128  }
 0x20f   :  { %500 = vsyncadd [#allocation4], 4294967168 }
 0x210   :  { %243 = vsyncpa [#allocation3], 1 }
 0x211   :  { %244 = vsyncpa [#allocation6], 1 }
 0x212   :  { %245 = vsyncpa [#allocation4], 1 }

// kernel: tpu_custom_call.1
= control target key start
LH: loop header
LB: loop body
LE: loop exit
PB: predicated region body
PF: predicated region fallthrough
CT: control target
= control target key end

     0   :  { %8 = vsyncpa [#allocation3], 0  ;;  %s600_s0 = inlined_call_operand.hbm [shape: f32[8,128], index: 0, kind: input, shape index: {}]   ;;  %s601_s1 = inlined_call_operand.hbm [shape: f32[128,128], index: 1, kind: input, shape index: {}]   ;;  %s602_s2 = inlined_call_operand.hbm [shape: f32[128,128], index: 2, kind: input, shape index: {}]   ;;  %s603_s3 = inlined_call_operand.hbm [shape: f32[8,128], index: 3, kind: output, shape index: {}]  }
   0x1   :  { %9 = vsyncpa [#allocation6], 0 }
   0x2   :  { %10 = vsyncpa [#allocation4], 0  ;;  %s501_s12 = smov [#allocation5]   ;;  %s407_s16 = scalar_lea.hbm %s601_s1, 2048 }
   0x3   :  { %s26_s13 = sshll.u32 %s501_s12, 4  ;;  %p408_p0 = scmp.ne.s32.totalorder %s601_s1, %s407_s16  ;;  %s27_s13 = int_to_ptr.vmem [resolvable:$true] %s26_s13 }
   0x4   :  { %p411_p1 = scmp.lt.u32.totalorder %s407_s16, %s601_s1 }
   0x6   :  { %p413_p2 = pnand %p411_p1, %p408_p0 }
   0x8   :  { %416 = shalt.err (!%p413_p2)
}
   0x9   :  { %s417_s21 = scalar_lea.vmem %s27_s13, 2048  ;;  %p422_p4 = scmp.lt.s32.totalorder %s27_s13, %s27_s13 }
   0xa   :  { %p418_p3 = scmp.ne.s32.totalorder %s27_s13, %s417_s21  ;;  %p423_p5 = scmp.lt.s32.totalorder %s417_s21, %s417_s21 }
   0xc   :  { %p424_p6 = por %p423_p5, %p422_p4 }
   0xe   :  { %p425_p7 = pnand %p424_p6, %p418_p3 }
  0x10   :  { %428 = shalt.err (!%p425_p7)
}
  0x11   :  { %s502_s22 = smov 128   ;;  %s503_s23 = smov 8  }
  0x12   :  { %32 = dma.hbm_to_vmem [thread:$0]  %s601_s1, 2048, %s27_s13, [#allocation6], %s502_s22, %s502_s22, %s503_s23  }
  0x13   :  { %s504_s26 = smov [#allocation2]   ;;  %s505_s28 = smov [#allocation7]  }
  0x14   :  { %s17_s27 = sshll.u32 %s504_s26, 4  ;;  %s38_s29 = sshll.u32 %s505_s28, 4  ;;  %s18_s27 = int_to_ptr.vmem [resolvable:$true] %s17_s27  ;;  %s39_s29 = int_to_ptr.vmem [resolvable:$true] %s38_s29 }
  0x15   :  { %s429_s5 = scalar_lea.hbm %s600_s0, 128 }
  0x16   :  { %p430_p8 = scmp.ne.s32.totalorder %s600_s0, %s429_s5  ;;  %p433_p9 = scmp.lt.u32.totalorder %s429_s5, %s600_s0 }
  0x18   :  { %p435_p10 = pnand %p433_p9, %p430_p8 }
  0x1a   :  { %438 = shalt.err (!%p435_p10)
}
  0x1b   :  { %s439_s1 = scalar_lea.vmem %s18_s27, 128  ;;  %p444_p12 = scmp.lt.s32.totalorder %s18_s27, %s18_s27 }
  0x1c   :  { %p440_p11 = scmp.ne.s32.totalorder %s18_s27, %s439_s1  ;;  %p445_p13 = scmp.lt.s32.totalorder %s439_s1, %s439_s1 }
  0x1e   :  { %p446_p0 = por %p445_p13, %p444_p12 }
  0x20   :  { %p447_p1 = pnand %p446_p0, %p440_p11 }
  0x22   :  { %450 = shalt.err (!%p447_p1)
}
  0x23   :  { %20 = dma.hbm_to_vmem [thread:$0]  %s600_s0, 128, %s18_s27, [#allocation3]  }
  0x24   :  { %s451_s14 = scalar_lea.hbm %s602_s2, 2048 }
  0x25   :  { %p452_p2 = scmp.ne.s32.totalorder %s602_s2, %s451_s14  ;;  %p455_p3 = scmp.lt.u32.totalorder %s451_s14, %s602_s2 }
  0x27   :  { %p457_p4 = pnand %p455_p3, %p452_p2 }
  0x29   :  { %460 = shalt.err (!%p457_p4)
}
  0x2a   :  { %s461_s19 = scalar_lea.vmem %s39_s29, 2048  ;;  %p466_p6 = scmp.lt.s32.totalorder %s39_s29, %s39_s29 }
  0x2b   :  { %p462_p5 = scmp.ne.s32.totalorder %s39_s29, %s461_s19  ;;  %p467_p7 = scmp.lt.s32.totalorder %s461_s19, %s461_s19 }
  0x2d   :  { %p468_p8 = por %p467_p7, %p466_p6 }
  0x2f   :  { %p469_p9 = pnand %p468_p8, %p462_p5 }
  0x31   :  { %472 = shalt.err (!%p469_p9)
}
  0x32   :  { %44 = dma.hbm_to_vmem [thread:$0]  %s602_s2, 2048, %s39_s29, [#allocation6], %s502_s22, %s502_s22, %s503_s23  }
  0x33   :  { %495 = dma.done.wait [#allocation3], 128  }
  0x34   :  { %496 = vsyncadd [#allocation3], 4294967168 }
  0x35   :  { %497 = dma.done.wait [#allocation6], 4096  }
  0x36   :  { %498 = vsyncadd [#allocation6], 4294963200  ;;  %v506_v0 = vmov 0.0|0.0   ;;  %vm507_vm0 = vmmov 0   ;;  %v508_v1 = vmov 0.0   ;;  %v54_v2 = vld [vmem:[#allocation5] sm:$0xff] }
  0x37   :  { %350 = vmatprep.subr.bf16.mxu0 %v506_v0  ;;  %312 = vmatprep.mubr.msk.f32.mxu0 %vm507_vm0, %v508_v1  ;;  %v55_v3 = vld [vmem:[#allocation5 + $0x8] sm:$0xff]  ;;  %v56_v4 = vld [vmem:[#allocation5 + $0x10] sm:$0xff]  ;;  %v57_v6 = vld [vmem:[#allocation5 + $0x18] sm:$0xff]  ;;  %s509_s2 = smov [#allocation8]  }
  0x38   :  { %374 = vmatprep.subr.bf16.mxu1 %v506_v0  ;;  %347 = vmatprep.mubr.msk.f32.mxu1 %vm507_vm0, %v508_v1  ;;  %v351_v5 = vpack.c.bf16 %v55_v3, %v54_v2  ;;  %v354_v7 = vpack.c.bf16 %v57_v6, %v56_v4  ;;  %v58_v8 = vld [vmem:[#allocation5 + $0x20] sm:$0xff]  ;;  %v59_v9 = vld [vmem:[#allocation5 + $0x28] sm:$0xff]  ;;  %v72_v12 = vld [vmem:[#allocation7 + $0x10] sm:$0xff]  ;;  %s236_s21 = sshll.u32 %s509_s2, 4  ;;  %s237_s21 = int_to_ptr.vmem [resolvable:$true] %s236_s21 }
  0x39   :  { %v70_v10 = vld [vmem:[#allocation7] sm:$0xff]  ;;  %v71_v11 = vld [vmem:[#allocation7 + $0x8] sm:$0xff]  ;;  %v73_v13 = vld [vmem:[#allocation7 + $0x18] sm:$0xff]  ;;  %v357_v14 = vpack.c.bf16 %v59_v9, %v58_v8  ;;  %s473_s22 = scalar_lea.vmem %s237_s21, 128  ;;  %p478_p11 = scmp.lt.s32.totalorder %s237_s21, %s237_s21 }
  0x3a   :  { %352 = vmatpush3.bf16.msra.mxu0 %v351_v5  ;;  %v375_v15 = vpack.c.bf16 %v71_v11, %v70_v10  ;;  %v60_v16 = vld [vmem:[#allocation5 + $0x30] sm:$0xff]  ;;  %v61_v17 = vld [vmem:[#allocation5 + $0x38] sm:$0xff]  ;;  %v378_v18 = vpack.c.bf16 %v73_v13, %v72_v12  ;;  %v74_v19 = vld [vmem:[#allocation7 + $0x20] sm:$0xff]  ;;  %p474_p10 = scmp.ne.s32.totalorder %s237_s21, %s473_s22  ;;  %p479_p12 = scmp.lt.s32.totalorder %s473_s22, %s473_s22 }
  0x3b   :  { %353 = vmatprep.subr.bf16.mxu0 %v506_v0  ;;  %v75_v20 = vld [vmem:[#allocation7 + $0x28] sm:$0xff]  ;;  %v360_v21 = vpack.c.bf16 %v61_v17, %v60_v16  ;;  %v62_v22 = vld [vmem:[#allocation5 + $0x40] sm:$0xff]  ;;  %v76_v25 = vld [vmem:[#allocation7 + $0x30] sm:$0xff] }
  0x3c   :  { %376 = vmatpush3.bf16.msra.mxu1 %v375_v15  ;;  %v63_v23 = vld [vmem:[#allocation5 + $0x48] sm:$0xff]  ;;  %v381_v24 = vpack.c.bf16 %v75_v20, %v74_v19  ;;  %v77_v26 = vld [vmem:[#allocation7 + $0x38] sm:$0xff]  ;;  %v64_v28 = vld [vmem:[#allocation5 + $0x50] sm:$0xff]  ;;  %p480_p13 = por %p479_p12, %p478_p11 }
  0x3d   :  { %377 = vmatprep.subr.bf16.mxu1 %v506_v0  ;;  %v363_v27 = vpack.c.bf16 %v63_v23, %v62_v22  ;;  %v65_v29 = vld [vmem:[#allocation5 + $0x58] sm:$0xff]  ;;  %v384_v30 = vpack.c.bf16 %v77_v26, %v76_v25  ;;  %v78_v31 = vld [vmem:[#allocation7 + $0x40] sm:$0xff]  ;;  %v79_v32 = vld [vmem:[#allocation7 + $0x48] sm:$0xff] }
  0x3e   :  { %355 = vmatpush3.bf16.msra.mxu0 %v354_v7  ;;  %v366_v33 = vpack.c.bf16 %v65_v29, %v64_v28  ;;  %v66_v34 = vld [vmem:[#allocation5 + $0x60] sm:$0xff]  ;;  %v67_v35 = vld [vmem:[#allocation5 + $0x68] sm:$0xff]  ;;  %v387_v36 = vpack.c.bf16 %v79_v32, %v78_v31  ;;  %v80_v37 = vld [vmem:[#allocation7 + $0x50] sm:$0xff]  ;;  %p481_p0 = pnand %p480_p13, %p474_p10 }
  0x3f   :  { %356 = vmatprep.subr.bf16.mxu0 %v506_v0  ;;  %v81_v38 = vld [vmem:[#allocation7 + $0x58] sm:$0xff]  ;;  %v369_v39 = vpack.c.bf16 %v67_v35, %v66_v34  ;;  %v68_v40 = vld [vmem:[#allocation5 + $0x70] sm:$0xff]  ;;  %v82_v43 = vld [vmem:[#allocation7 + $0x60] sm:$0xff] }
  0x40   :  { %379 = vmatpush3.bf16.msra.mxu1 %v378_v18  ;;  %v69_v41 = vld [vmem:[#allocation5 + $0x78] sm:$0xff]  ;;  %v390_v42 = vpack.c.bf16 %v81_v38, %v80_v37  ;;  %v83_v44 = vld [vmem:[#allocation7 + $0x68] sm:$0xff]  ;;  %v84_v48 = vld [vmem:[#allocation7 + $0x70] sm:$0xff] }
  0x41   :  { %380 = vmatprep.subr.bf16.mxu1 %v506_v0  ;;  %v372_v45 = vpack.c.bf16 %v69_v41, %v68_v40  ;;  %v393_v46 = vpack.c.bf16 %v83_v44, %v82_v43  ;;  %v86_v47 = vld [vmem:[#allocation2] sm:$0xff] }
  0x42   :  { %358 = vmatpush3.bf16.msra.mxu0 %v357_v14  ;;  %v85_v49 = vld [vmem:[#allocation7 + $0x78] sm:$0xff] }
  0x43   :  { %359 = vmatprep.subr.bf16.mxu0 %v506_v0  ;;  %v396_v50 = vpack.c.bf16 %v85_v49, %v84_v48 }
  0x44   :  { %382 = vmatpush3.bf16.msra.mxu1 %v381_v24 }
  0x45   :  { %383 = vmatprep.subr.bf16.mxu1 %v506_v0 }
  0x46   :  { %361 = vmatpush3.bf16.msra.mxu0 %v360_v21 }
  0x47   :  { %362 = vmatprep.subr.bf16.mxu0 %v506_v0 }
  0x48   :  { %385 = vmatpush3.bf16.msra.mxu1 %v384_v30 }
  0x49   :  { %386 = vmatprep.subr.bf16.mxu1 %v506_v0 }
  0x4a   :  { %364 = vmatpush3.bf16.msra.mxu0 %v363_v27 }
  0x4b   :  { %365 = vmatprep.subr.bf16.mxu0 %v506_v0 }
  0x4c   :  { %388 = vmatpush3.bf16.msra.mxu1 %v387_v36 }
  0x4d   :  { %389 = vmatprep.subr.bf16.mxu1 %v506_v0 }
  0x4e   :  { %367 = vmatpush3.bf16.msra.mxu0 %v366_v33 }
  0x4f   :  { %368 = vmatprep.subr.bf16.mxu0 %v506_v0 }
  0x50   :  { %391 = vmatpush3.bf16.msra.mxu1 %v390_v42 }
  0x51   :  { %392 = vmatprep.subr.bf16.mxu1 %v506_v0 }
  0x52   :  { %370 = vmatpush3.bf16.msra.mxu0 %v369_v39 }
  0x53   :  { %371 = vmatprep.subr.bf16.mxu0 %v506_v0 }
  0x54   :  { %394 = vmatpush3.bf16.msra.mxu1 %v393_v46 }
  0x55   :  { %395 = vmatprep.subr.bf16.mxu1 %v506_v0 }
  0x56   :  { %373 = vmatpush3.bf16.msra.mxu0 %v372_v45 }
  0x58   :  { %397 = vmatpush3.bf16.msra.mxu1 %v396_v50 }
  0x59   :  { %313 = vmatmul.mubr.f32.vlgmr.msra.gmra.mrb[0].mxu0 %v86_v47 }
 0x12c   :  { %v153_v51 = vpop.f32.mrb[0].mxu0 }
 0x12d   :  { %v157_v52 = vmax.f32 %v153_v51, 0.0  ;;  %v314_v53 = vpop.f32.mrb[1].mxu0 }
 0x12f   :  { %348 = vmatmul.mubr.f32.vlgmr.msra.gmra.mrb[0].mxu1 %v157_v52 }
 0x202   :  { %v224_v54 = vpop.f32.mrb[0].mxu1 }
 0x203   :  { %v228_v55 = vmax.f32 %v224_v54, 0.0  ;;  %v349_v56 = vpop.f32.mrb[1].mxu1 }
 0x205   :  { %229 = vst [vmem:[#allocation8] sm:$0xff] %v228_v55 }
 0x206   :  { %484 = shalt.err (!%p481_p0)
}
 0x207   :  { %s485_s25 = scalar_lea.hbm %s603_s3, 128 }
 0x208   :  { %p486_p1 = scmp.ne.s32.totalorder %s603_s3, %s485_s25  ;;  %p489_p2 = scmp.lt.u32.totalorder %s485_s25, %s603_s3 }
 0x20a   :  { %p491_p3 = pnand %p489_p2, %p486_p1 }
 0x20c   :  { %494 = shalt.err (!%p491_p3)
}
 0x20d   :  { %239 = dma.vmem_to_hbm [thread:$0]  %s237_s21, 128, %s603_s3, [#allocation4]  }
 0x20e   :  { %499 = dma.done.wait [#allocation4], 128  }
 0x20f   :  { %500 = vsyncadd [#allocation4], 4294967168 }
 0x210   :  { %243 = vsyncpa [#allocation3], 1 }
 0x211   :  { %244 = vsyncpa [#allocation6], 1 }
 0x212   :  { %245 = vsyncpa [#allocation4], 1 }

</bundles_post_ra>
